<compile_context>
chip_gen: v6e
topology: v6e:2x2x1
jax: 0.10.0
libtpu: 0.0.40
codegen_flags: <defaults>
</compile_context>

<pallas_src>
import functools

import jax
import jax.numpy as jnp
from jax import lax
from jax.experimental import pallas as pl
from jax.experimental.pallas import tpu as pltpu


def _round_up(n, m):
    return ((n + m - 1) // m) * m


def _make_rnn_kernel(Tc, Bb, Hp, n_chains, pad_steps, compute_dtype, unroll):
    """Builds the per-(batch-block, time-chunk) kernel body.

    Refs (in order):
      x_ref:     (Tc, Bb, I)   raw input chunk (f32, time-major)
      w_ihT_ref: (I,  Hp)      input->hidden weight^T           (Buffered(1))
      bias_ref:  (1,  Hp) f32  b_ih + b_hh                      (Buffered(1))
      w_hhT_ref: (Hp, Hp)      hidden->hidden weight^T          (Buffered(1))
      w_fcT_ref: (Hp, Op)      fc weight^T                      (Buffered(1))
      b_fc_ref:  (1,  Op) f32  fc bias                          (Buffered(1))
      out_ref:   (Bb, Op) f32  output block (written on last chunk only)
      h_ref:     (Bb, Hp) f32  hidden-state carry (VMEM scratch)
      xw_ref:    (Tc*Bb, Hp)   per-chunk xW scratch (compute dtype)
    """
    f32 = jnp.float32
    rows = Bb // n_chains

    def kernel(x_ref, w_ihT_ref, bias_ref, w_hhT_ref, w_fcT_ref, b_fc_ref,
               out_ref, h_ref, xw_ref):
        c = pl.program_id(1)  # time-chunk index (sequential / "arbitrary")

        @pl.when(c == 0)
        def _():
            h_ref[...] = jnp.zeros_like(h_ref)

        # ---- chunk-level input projection: one big MXU matmul per chunk ----
        I = x_ref.shape[-1]
        x_flat = x_ref[...].reshape(Tc * Bb, I).astype(compute_dtype)
        xw = jnp.dot(x_flat, w_ihT_ref[...],
                     preferred_element_type=jnp.float32) + bias_ref[...]
        if pad_steps > 0:
            # The first chunk starts with `pad_steps` prepended zero time
            # steps; kill their bias contribution so h stays exactly 0 there.
            row = lax.broadcasted_iota(jnp.int32, (Tc * Bb, 1), 0)
            keep = jnp.logical_or(c > 0, row >= pad_steps * Bb)
            xw = jnp.where(keep, xw, 0.0)
        xw_ref[...] = xw.astype(xw_ref.dtype)

        # ---- sequential recurrence: h_t = tanh(xW_t + h_{t-1} @ W_hh^T) ----
        def step(t, hs):
            off = pl.multiple_of(t * Bb, Bb)
            xw_t = xw_ref[pl.ds(off, Bb), :].astype(f32)      # (Bb, Hp)
            new = []
            for ci in range(n_chains):  # independent sub-chains, interleaved
                h_c = hs[ci]
                pre = (xw_t[ci * rows:(ci + 1) * rows, :]
                       + jnp.dot(h_c.astype(compute_dtype), w_hhT_ref[...],
                                 preferred_element_type=jnp.float32))
                new.append(jnp.tanh(pre))
            return tuple(new)

        hs0 = tuple(h_ref[pl.ds(ci * rows, rows), :] for ci in range(n_chains))
        hs = lax.fori_loop(0, Tc, step, hs0, unroll=unroll)
        for ci in range(n_chains):
            h_ref[pl.ds(ci * rows, rows), :] = hs[ci]

        # ---- final Linear, only on the very last time chunk ----
        @pl.when(c == pl.num_programs(1) - 1)
        def _():
            h = h_ref[...]
            out = (jnp.dot(h.astype(compute_dtype), w_fcT_ref[...],
                           preferred_element_type=jnp.float32)
                   + b_fc_ref[...])
            out_ref[...] = out.astype(out_ref.dtype)

    return kernel


def rnn_model_forward(x, params, *, time_chunk=64, batch_block=None,
                      compute_dtype=jnp.bfloat16):
    """x: (B, T, I) float32 (batch_first, like PyTorch). Returns (B, O) f32.

    batch_block: None -> single batch block (best on v5e/v6e). On v7x set
    batch_block = ceil(B/2) rounded to 8 to shard across the two TensorCores.
    """
    B, T, I = x.shape
    w_ih, w_hh, b_ih, b_hh, w_fc, b_fc = (
        params["w_ih"], params["w_hh"], params["b_ih"],
        params["b_hh"], params["w_fc"], params["b_fc"],
    )
    H = w_ih.shape[0]
    O = w_fc.shape[0]
    f32 = jnp.float32
    cdt = jnp.dtype(compute_dtype)

    # -------- padded, hardware-friendly sizes --------
    Bp = _round_up(B, 8)       # f32 sublane
    Hp = _round_up(H, 128)     # lane width
    Op = _round_up(O, 128)     # lane-dense output store

    # Zero-padded, pre-transposed weights (cast to compute dtype).  Zero
    # rows/cols keep padded lanes exactly 0 through the recurrence.
    w_ihT = jnp.zeros((I, Hp), f32).at[:, :H].set(w_ih.T).astype(cdt)
    w_hhT = jnp.zeros((Hp, Hp), f32).at[:H, :H].set(w_hh.T).astype(cdt)
    bias = jnp.zeros((1, Hp), f32).at[0, :H].set(b_ih + b_hh)      # keep f32
    w_fcT = jnp.zeros((Hp, Op), f32).at[:H, :O].set(w_fc.T).astype(cdt)
    b_fc_p = jnp.zeros((1, Op), f32).at[0, :O].set(b_fc)           # keep f32

    # Time-major x, zero-padded batch rows; zero time steps are PREPENDED so
    # the real last step lands at the end of the last chunk (the kernel masks
    # the bias on the prepended steps so h stays exactly 0 there).
    x_tm = jnp.transpose(x.astype(f32), (1, 0, 2))                 # (T, B, I)
    if Bp != B:
        x_tm = jnp.pad(x_tm, ((0, 0), (0, Bp - B), (0, 0)))
    Tc = max(1, min(time_chunk, T))
    Tp = _round_up(T, Tc)
    pad_steps = Tp - T
    if pad_steps:
        x_tm = jnp.pad(x_tm, ((pad_steps, 0), (0, 0), (0, 0)))
    n_chunks = Tp // Tc

    # Batch blocking (single block by default; see docstring for v7x).
    Bb = Bp if batch_block is None else _round_up(min(batch_block, Bp), 8)
    if Bp % Bb != 0:
        Bb = Bp
    n_bblk = Bp // Bb

    n_chains = 2 if (Bb >= 16 and Bb % 16 == 0) else 1
    unroll = True if Tc <= 16 else 8

    # -------- VMEM budget -> explicit vmem_limit_bytes --------
    cbytes = cdt.itemsize
    need = (2 * Tc * Bb * I * 4            # x chunk stream (double-buffered)
            + I * Hp * cbytes + Hp * 4     # W_ih^T + bias (single-buffered)
            + Hp * Hp * cbytes             # W_hh^T (single-buffered)
            + Hp * Op * cbytes + Op * 4    # W_fc^T + b_fc (single-buffered)
            + 2 * Bb * Op * 4              # output block
            + Bb * Hp * 4                  # h carry scratch
            + Tc * Bb * Hp * cbytes)       # per-chunk xW scratch
    vmem_limit = int(min(max(need * 3 // 2 + (8 << 20), 32 << 20), 64 << 20))
    # TODO(synk): on v5e/v6e (128 MiB VMEM) the 64 MiB cap can be raised to
    # ~100 MiB to allow larger time chunks at production hidden sizes.

    kernel = _make_rnn_kernel(Tc, Bb, Hp, n_chains, pad_steps, cdt, unroll)

    grid_spec = pltpu.PrefetchScalarGridSpec(
        num_scalar_prefetch=0,
        grid=(n_bblk, n_chunks),
        in_specs=[
            pl.BlockSpec((Tc, Bb, I), lambda b, c: (c, b, 0)),     # x chunk
            pl.BlockSpec((I, Hp), lambda b, c: (0, 0),
                         pipeline_mode=pl.Buffered(1)),            # W_ih^T
            pl.BlockSpec((1, Hp), lambda b, c: (0, 0),
                         pipeline_mode=pl.Buffered(1)),            # bias
            pl.BlockSpec((Hp, Hp), lambda b, c: (0, 0),
                         pipeline_mode=pl.Buffered(1)),            # W_hh^T
            pl.BlockSpec((Hp, Op), lambda b, c: (0, 0),
                         pipeline_mode=pl.Buffered(1)),            # W_fc^T
            pl.BlockSpec((1, Op), lambda b, c: (0, 0),
                         pipeline_mode=pl.Buffered(1)),            # b_fc
        ],
        out_specs=pl.BlockSpec((Bb, Op), lambda b, c: (b, 0)),     # resident out
        scratch_shapes=[
            pltpu.VMEM((Bb, Hp), jnp.float32),                     # h carry
            pltpu.VMEM((Tc * Bb, Hp), cdt),                        # xW chunk
        ],
    )

    out_p = pl.pallas_call(
        kernel,
        out_shape=jax.ShapeDtypeStruct((Bp, Op), f32),
        grid_spec=grid_spec,
        compiler_params=pltpu.CompilerParams(
            # batch blocks are independent; time chunks are sequential
            dimension_semantics=("parallel", "arbitrary"),
            vmem_limit_bytes=vmem_limit),
    )(x_tm, w_ihT, bias, w_hhT, w_fcT, b_fc_p)

    return out_p[:B, :O]


def init_params(key, input_size, hidden_size, output_size):
    """Deterministic init mimicking PyTorch's uniform(-1/sqrt(H), 1/sqrt(H))."""
    ks = jax.random.split(key, 6)
    s = 1.0 / jnp.sqrt(hidden_size)
    u = lambda k, shape: jax.random.uniform(
        k, shape, jnp.float32, minval=-s, maxval=s)
    return {
        "w_ih": u(ks[0], (hidden_size, input_size)),
        "w_hh": u(ks[1], (hidden_size, hidden_size)),
        "b_ih": u(ks[2], (hidden_size,)),
        "b_hh": u(ks[3], (hidden_size,)),
        "w_fc": u(ks[4], (output_size, hidden_size)),
        "b_fc": u(ks[5], (output_size,)),
    }


def reference_forward(x, params):
    """Pure-JAX reference (matches PyTorch RNN + Linear forward semantics)."""
    B, T, I = x.shape
    H = params["w_ih"].shape[0]
    h = jnp.zeros((B, H), jnp.float32)
    for t in range(T):
        h = jnp.tanh(x[:, t, :] @ params["w_ih"].T
                     + h @ params["w_hh"].T
                     + params["b_ih"] + params["b_hh"])
    return h @ params["w_fc"].T + params["b_fc"]


def _run_case(key, B, T, I, H, O, *, time_chunk, compute_dtype, batch_block,
              atol, rtol):
    kx, kp = jax.random.split(key)
    x = jax.random.normal(kx, (B, T, I), jnp.float32)
    params = init_params(kp, I, H, O)
    fwd = jax.jit(functools.partial(
        rnn_model_forward, time_chunk=time_chunk,
        compute_dtype=compute_dtype, batch_block=batch_block))
    out = jax.block_until_ready(fwd(x, params))
    ref = reference_forward(x, params)
    assert out.shape == (B, O), (out.shape, (B, O))
    assert jnp.allclose(out, ref, atol=atol, rtol=rtol), (
        f"mismatch: max abs err = {jnp.max(jnp.abs(out - ref))}")


if __name__ == "__main__":
    key = jax.random.PRNGKey(0)
    keys = jax.random.split(key, 4)

    # (a) f32 path, single time chunk -> tight tolerance correctness anchor.
    _run_case(keys[0], B=2, T=8, I=16, H=32, O=4,
              time_chunk=32, compute_dtype=jnp.float32, batch_block=None,
              atol=1e-4, rtol=1e-4)

    # (b) bf16 path, time padding + multiple chunks.
    _run_case(keys[1], B=2, T=8, I=16, H=32, O=4,
              time_chunk=3, compute_dtype=jnp.bfloat16, batch_block=None,
              atol=2e-2, rtol=2e-2)

    # (c) bf16 path, larger batch -> dual sub-chain recurrence exercised.
    _run_case(keys[2], B=16, T=10, I=16, H=32, O=4,
              time_chunk=4, compute_dtype=jnp.bfloat16, batch_block=None,
              atol=2e-2, rtol=2e-2)

    # (d) bf16 path, two batch blocks (v7x-style sharding) + dual sub-chains.
    _run_case(keys[3], B=32, T=6, I=16, H=32, O=4,
              time_chunk=4, compute_dtype=jnp.bfloat16, batch_block=16,
              atol=2e-2, rtol=2e-2)

    print("KERNEL_OK")
</pallas_src>

<mosaic_0001>
module attributes {stable_mosaic.version = 11 : i64} {
  func.func @kernel(%arg0: i32, %arg1: i32, %arg2: memref<8x8x16xf32, #tpu.memory_space<vmem>>, %arg3: memref<16x128xf32, #tpu.memory_space<vmem>>, %arg4: memref<1x128xf32, #tpu.memory_space<vmem>>, %arg5: memref<128x128xf32, #tpu.memory_space<vmem>>, %arg6: memref<128x128xf32, #tpu.memory_space<vmem>>, %arg7: memref<1x128xf32, #tpu.memory_space<vmem>>, %arg8: memref<8x128xf32, #tpu.memory_space<vmem>>, %arg9: memref<8x128xf32, #tpu.memory_space<vmem>>, %arg10: memref<64x128xf32, #tpu.memory_space<vmem>>) attributes {dimension_semantics = [#tpu.dimension_semantics<parallel>, #tpu.dimension_semantics<arbitrary>], iteration_bounds = array<i64: 1, 1>, scalar_prefetch = 0 : i64, scratch_operands = 2 : i64, tpu.core_type = #tpu.core_type<tc>, window_params = [{transform_indices = @transform_0, window_bounds = array<i64: 8, 8, 16>}, {pipeline_mode = #tpu.pipeline_mode<synchronous>, transform_indices = @transform_1, window_bounds = array<i64: 16, 128>}, {pipeline_mode = #tpu.pipeline_mode<synchronous>, transform_indices = @transform_2, window_bounds = array<i64: 1, 128>}, {pipeline_mode = #tpu.pipeline_mode<synchronous>, transform_indices = @transform_3, window_bounds = array<i64: 128, 128>}, {pipeline_mode = #tpu.pipeline_mode<synchronous>, transform_indices = @transform_4, window_bounds = array<i64: 128, 128>}, {pipeline_mode = #tpu.pipeline_mode<synchronous>, transform_indices = @transform_5, window_bounds = array<i64: 1, 128>}, {transform_indices = @transform_6, window_bounds = array<i64: 8, 128>}]} {
    %c0_i32 = arith.constant 0 : i32
    %0 = arith.cmpi eq, %arg1, %c0_i32 : i32
    %1 = arith.extui %0 : i1 to i32
    %c0_i32_0 = arith.constant 0 : i32
    %2 = arith.cmpi ne, %1, %c0_i32_0 : i32
    scf.if %2 {
      %cst_56 = arith.constant 0.000000e+00 : f32
      %80 = vector.broadcast %cst_56 : f32 to vector<8x128xf32>
      %c0_57 = arith.constant 0 : index
      %c0_58 = arith.constant 0 : index
      %81 = vector.load %arg9[%c0_57, %c0_58] : memref<8x128xf32, #tpu.memory_space<vmem>>, vector<8x128xf32>
      tpu.vector_store %arg9[%c0_57, %c0_58], %80 {strides = array<i32>} : memref<8x128xf32, #tpu.memory_space<vmem>>, vector<8x128xf32>,
    } else {
    }
    %c0 = arith.constant 0 : index
    %c0_1 = arith.constant 0 : index
    %c0_2 = arith.constant 0 : index
    %3 = vector.load %arg2[%c0, %c0_1, %c0_2] : memref<8x8x16xf32, #tpu.memory_space<vmem>>, vector<8x8x16xf32>
    %4 = vector.shape_cast %3 : vector<8x8x16xf32> to vector<64x16xf32>
    %c0_3 = arith.constant 0 : index
    %c0_4 = arith.constant 0 : index
    %5 = vector.load %arg3[%c0_3, %c0_4] : memref<16x128xf32, #tpu.memory_space<vmem>>, vector<16x128xf32>
    %cst = arith.constant dense<0.000000e+00> : vector<64x128xf32>
    %6 = tpu.matmul %4, %5, %cst {dimension_numbers = #tpu.dot_dimension_numbers<[1], [0], [0], [1], [0, 0, 1, 1], [], []>} : vector<64x16xf32>, vector<16x128xf32>, vector<64x128xf32> -> vector<64x128xf32>
    %c0_5 = arith.constant 0 : index
    %c0_6 = arith.constant 0 : index
    %7 = vector.load %arg4[%c0_5, %c0_6] : memref<1x128xf32, #tpu.memory_space<vmem>>, vector<1x128xf32>
    %8 = vector.broadcast %7 : vector<1x128xf32> to vector<64x128xf32>
    %9 = arith.addf %6, %8 : vector<64x128xf32>
    %c0_7 = arith.constant 0 : index
    %c0_8 = arith.constant 0 : index
    %10 = vector.load %arg10[%c0_7, %c0_8] : memref<64x128xf32, #tpu.memory_space<vmem>>, vector<64x128xf32>
    tpu.vector_store %arg10[%c0_7, %c0_8], %9 {strides = array<i32>} : memref<64x128xf32, #tpu.memory_space<vmem>>, vector<64x128xf32>,
    %c0_9 = arith.constant 0 : index
    %c0_10 = arith.constant 0 : index
    %11 = vector.load %arg9[%c0_9, %c0_10] : memref<8x128xf32, #tpu.memory_space<vmem>>, vector<8x128xf32>
    %c0_i32_11 = arith.constant 0 : i32
    %c8_i32 = arith.constant 8 : i32
    %12 = arith.muli %c0_i32_11, %c8_i32 : i32
    %13 = tpu.assume_multiple %12, 8 : i32
    %14 = arith.index_cast %13 : i32 to index
    %c0_12 = arith.constant 0 : index
    %15 = vector.load %arg10[%14, %c0_12] : memref<64x128xf32, #tpu.memory_space<vmem>>, vector<8x128xf32>
    %c0_13 = arith.constant 0 : index
    %c0_14 = arith.constant 0 : index
    %16 = vector.load %arg5[%c0_13, %c0_14] : memref<128x128xf32, #tpu.memory_space<vmem>>, vector<128x128xf32>
    %cst_15 = arith.constant dense<0.000000e+00> : vector<8x128xf32>
    %17 = tpu.matmul %11, %16, %cst_15 {dimension_numbers = #tpu.dot_dimension_numbers<[1], [0], [0], [1], [0, 0, 1, 1], [], []>} : vector<8x128xf32>, vector<128x128xf32>, vector<8x128xf32> -> vector<8x128xf32>
    %18 = arith.addf %15, %17 : vector<8x128xf32>
    %19 = math.tanh %18 : vector<8x128xf32>
    %c1_i32 = arith.constant 1 : i32
    %c8_i32_16 = arith.constant 8 : i32
    %20 = arith.muli %c1_i32, %c8_i32_16 : i32
    %21 = tpu.assume_multiple %20, 8 : i32
    %22 = arith.index_cast %21 : i32 to index
    %c0_17 = arith.constant 0 : index
    %23 = vector.load %arg10[%22, %c0_17] : memref<64x128xf32, #tpu.memory_space<vmem>>, vector<8x128xf32>
    %c0_18 = arith.constant 0 : index
    %c0_19 = arith.constant 0 : index
    %24 = vector.load %arg5[%c0_18, %c0_19] : memref<128x128xf32, #tpu.memory_space<vmem>>, vector<128x128xf32>
    %cst_20 = arith.constant dense<0.000000e+00> : vector<8x128xf32>
    %25 = tpu.matmul %19, %24, %cst_20 {dimension_numbers = #tpu.dot_dimension_numbers<[1], [0], [0], [1], [0, 0, 1, 1], [], []>} : vector<8x128xf32>, vector<128x128xf32>, vector<8x128xf32> -> vector<8x128xf32>
    %26 = arith.addf %23, %25 : vector<8x128xf32>
    %27 = math.tanh %26 : vector<8x128xf32>
    %c2_i32 = arith.constant 2 : i32
    %c8_i32_21 = arith.constant 8 : i32
    %28 = arith.muli %c2_i32, %c8_i32_21 : i32
    %29 = tpu.assume_multiple %28, 8 : i32
    %30 = arith.index_cast %29 : i32 to index
    %c0_22 = arith.constant 0 : index
    %31 = vector.load %arg10[%30, %c0_22] : memref<64x128xf32, #tpu.memory_space<vmem>>, vector<8x128xf32>
    %c0_23 = arith.constant 0 : index
    %c0_24 = arith.constant 0 : index
    %32 = vector.load %arg5[%c0_23, %c0_24] : memref<128x128xf32, #tpu.memory_space<vmem>>, vector<128x128xf32>
    %cst_25 = arith.constant dense<0.000000e+00> : vector<8x128xf32>
    %33 = tpu.matmul %27, %32, %cst_25 {dimension_numbers = #tpu.dot_dimension_numbers<[1], [0], [0], [1], [0, 0, 1, 1], [], []>} : vector<8x128xf32>, vector<128x128xf32>, vector<8x128xf32> -> vector<8x128xf32>
    %34 = arith.addf %31, %33 : vector<8x128xf32>
    %35 = math.tanh %34 : vector<8x128xf32>
    %c3_i32 = arith.constant 3 : i32
    %c8_i32_26 = arith.constant 8 : i32
    %36 = arith.muli %c3_i32, %c8_i32_26 : i32
    %37 = tpu.assume_multiple %36, 8 : i32
    %38 = arith.index_cast %37 : i32 to index
    %c0_27 = arith.constant 0 : index
    %39 = vector.load %arg10[%38, %c0_27] : memref<64x128xf32, #tpu.memory_space<vmem>>, vector<8x128xf32>
    %c0_28 = arith.constant 0 : index
    %c0_29 = arith.constant 0 : index
    %40 = vector.load %arg5[%c0_28, %c0_29] : memref<128x128xf32, #tpu.memory_space<vmem>>, vector<128x128xf32>
    %cst_30 = arith.constant dense<0.000000e+00> : vector<8x128xf32>
    %41 = tpu.matmul %35, %40, %cst_30 {dimension_numbers = #tpu.dot_dimension_numbers<[1], [0], [0], [1], [0, 0, 1, 1], [], []>} : vector<8x128xf32>, vector<128x128xf32>, vector<8x128xf32> -> vector<8x128xf32>
    %42 = arith.addf %39, %41 : vector<8x128xf32>
    %43 = math.tanh %42 : vector<8x128xf32>
    %c4_i32 = arith.constant 4 : i32
    %c8_i32_31 = arith.constant 8 : i32
    %44 = arith.muli %c4_i32, %c8_i32_31 : i32
    %45 = tpu.assume_multiple %44, 8 : i32
    %46 = arith.index_cast %45 : i32 to index
    %c0_32 = arith.constant 0 : index
    %47 = vector.load %arg10[%46, %c0_32] : memref<64x128xf32, #tpu.memory_space<vmem>>, vector<8x128xf32>
    %c0_33 = arith.constant 0 : index
    %c0_34 = arith.constant 0 : index
    %48 = vector.load %arg5[%c0_33, %c0_34] : memref<128x128xf32, #tpu.memory_space<vmem>>, vector<128x128xf32>
    %cst_35 = arith.constant dense<0.000000e+00> : vector<8x128xf32>
    %49 = tpu.matmul %43, %48, %cst_35 {dimension_numbers = #tpu.dot_dimension_numbers<[1], [0], [0], [1], [0, 0, 1, 1], [], []>} : vector<8x128xf32>, vector<128x128xf32>, vector<8x128xf32> -> vector<8x128xf32>
    %50 = arith.addf %47, %49 : vector<8x128xf32>
    %51 = math.tanh %50 : vector<8x128xf32>
    %c5_i32 = arith.constant 5 : i32
    %c8_i32_36 = arith.constant 8 : i32
    %52 = arith.muli %c5_i32, %c8_i32_36 : i32
    %53 = tpu.assume_multiple %52, 8 : i32
    %54 = arith.index_cast %53 : i32 to index
    %c0_37 = arith.constant 0 : index
    %55 = vector.load %arg10[%54, %c0_37] : memref<64x128xf32, #tpu.memory_space<vmem>>, vector<8x128xf32>
    %c0_38 = arith.constant 0 : index
    %c0_39 = arith.constant 0 : index
    %56 = vector.load %arg5[%c0_38, %c0_39] : memref<128x128xf32, #tpu.memory_space<vmem>>, vector<128x128xf32>
    %cst_40 = arith.constant dense<0.000000e+00> : vector<8x128xf32>
    %57 = tpu.matmul %51, %56, %cst_40 {dimension_numbers = #tpu.dot_dimension_numbers<[1], [0], [0], [1], [0, 0, 1, 1], [], []>} : vector<8x128xf32>, vector<128x128xf32>, vector<8x128xf32> -> vector<8x128xf32>
    %58 = arith.addf %55, %57 : vector<8x128xf32>
    %59 = math.tanh %58 : vector<8x128xf32>
    %c6_i32 = arith.constant 6 : i32
    %c8_i32_41 = arith.constant 8 : i32
    %60 = arith.muli %c6_i32, %c8_i32_41 : i32
    %61 = tpu.assume_multiple %60, 8 : i32
    %62 = arith.index_cast %61 : i32 to index
    %c0_42 = arith.constant 0 : index
    %63 = vector.load %arg10[%62, %c0_42] : memref<64x128xf32, #tpu.memory_space<vmem>>, vector<8x128xf32>
    %c0_43 = arith.constant 0 : index
    %c0_44 = arith.constant 0 : index
    %64 = vector.load %arg5[%c0_43, %c0_44] : memref<128x128xf32, #tpu.memory_space<vmem>>, vector<128x128xf32>
    %cst_45 = arith.constant dense<0.000000e+00> : vector<8x128xf32>
    %65 = tpu.matmul %59, %64, %cst_45 {dimension_numbers = #tpu.dot_dimension_numbers<[1], [0], [0], [1], [0, 0, 1, 1], [], []>} : vector<8x128xf32>, vector<128x128xf32>, vector<8x128xf32> -> vector<8x128xf32>
    %66 = arith.addf %63, %65 : vector<8x128xf32>
    %67 = math.tanh %66 : vector<8x128xf32>
    %c7_i32 = arith.constant 7 : i32
    %c8_i32_46 = arith.constant 8 : i32
    %68 = arith.muli %c7_i32, %c8_i32_46 : i32
    %69 = tpu.assume_multiple %68, 8 : i32
    %70 = arith.index_cast %69 : i32 to index
    %c0_47 = arith.constant 0 : index
    %71 = vector.load %arg10[%70, %c0_47] : memref<64x128xf32, #tpu.memory_space<vmem>>, vector<8x128xf32>
    %c0_48 = arith.constant 0 : index
    %c0_49 = arith.constant 0 : index
    %72 = vector.load %arg5[%c0_48, %c0_49] : memref<128x128xf32, #tpu.memory_space<vmem>>, vector<128x128xf32>
    %cst_50 = arith.constant dense<0.000000e+00> : vector<8x128xf32>
    %73 = tpu.matmul %67, %72, %cst_50 {dimension_numbers = #tpu.dot_dimension_numbers<[1], [0], [0], [1], [0, 0, 1, 1], [], []>} : vector<8x128xf32>, vector<128x128xf32>, vector<8x128xf32> -> vector<8x128xf32>
    %74 = arith.addf %71, %73 : vector<8x128xf32>
    %75 = math.tanh %74 : vector<8x128xf32>
    %c8_i32_51 = arith.constant 8 : i32
    %c0_52 = arith.constant 0 : index
    %c0_53 = arith.constant 0 : index
    %76 = vector.load %arg9[%c0_52, %c0_53] : memref<8x128xf32, #tpu.memory_space<vmem>>, vector<8x128xf32>
    tpu.vector_store %arg9[%c0_52, %c0_53], %75 {strides = array<i32>} : memref<8x128xf32, #tpu.memory_space<vmem>>, vector<8x128xf32>,
    %c0_i32_54 = arith.constant 0 : i32
    %77 = arith.cmpi eq, %arg1, %c0_i32_54 : i32
    %78 = arith.extui %77 : i1 to i32
    %c0_i32_55 = arith.constant 0 : i32
    %79 = arith.cmpi ne, %78, %c0_i32_55 : i32
    scf.if %79 {
      %c0_56 = arith.constant 0 : index
      %c0_57 = arith.constant 0 : index
      %80 = vector.load %arg9[%c0_56, %c0_57] : memref<8x128xf32, #tpu.memory_space<vmem>>, vector<8x128xf32>
      %c0_58 = arith.constant 0 : index
      %c0_59 = arith.constant 0 : index
      %81 = vector.load %arg6[%c0_58, %c0_59] : memref<128x128xf32, #tpu.memory_space<vmem>>, vector<128x128xf32>
      %cst_60 = arith.constant dense<0.000000e+00> : vector<8x128xf32>
      %82 = tpu.matmul %80, %81, %cst_60 {dimension_numbers = #tpu.dot_dimension_numbers<[1], [0], [0], [1], [0, 0, 1, 1], [], []>} : vector<8x128xf32>, vector<128x128xf32>, vector<8x128xf32> -> vector<8x128xf32>
      %c0_61 = arith.constant 0 : index
      %c0_62 = arith.constant 0 : index
      %83 = vector.load %arg7[%c0_61, %c0_62] : memref<1x128xf32, #tpu.memory_space<vmem>>, vector<1x128xf32>
      %84 = vector.broadcast %83 : vector<1x128xf32> to vector<8x128xf32>
      %85 = arith.addf %82, %84 : vector<8x128xf32>
      %c0_63 = arith.constant 0 : index
      %c0_64 = arith.constant 0 : index
      %86 = vector.load %arg8[%c0_63, %c0_64] : memref<8x128xf32, #tpu.memory_space<vmem>>, vector<8x128xf32>
      tpu.vector_store %arg8[%c0_63, %c0_64], %85 {strides = array<i32>} : memref<8x128xf32, #tpu.memory_space<vmem>>, vector<8x128xf32>,
    } else {
    }
    return
  }
  func.func @transform_0(%arg0: i32, %arg1: i32) -> (i32, i32, i32) {
    %c0_i32 = arith.constant 0 : i32
    %c0_i32_0 = arith.constant 0 : i32
    return %arg1, %arg0, %c0_i32 : i32, i32, i32
  }
  func.func @transform_1(%arg0: i32, %arg1: i32) -> (i32, i32) {
    %c0_i32 = arith.constant 0 : i32
    %c0_i32_0 = arith.constant 0 : i32
    %c0_i32_1 = arith.constant 0 : i32
    return %c0_i32, %c0_i32_0 : i32, i32
  }
  func.func @transform_2(%arg0: i32, %arg1: i32) -> (i32, i32) {
    %c0_i32 = arith.constant 0 : i32
    %c0_i32_0 = arith.constant 0 : i32
    %c0_i32_1 = arith.constant 0 : i32
    return %c0_i32, %c0_i32_0 : i32, i32
  }
  func.func @transform_3(%arg0: i32, %arg1: i32) -> (i32, i32) {
    %c0_i32 = arith.constant 0 : i32
    %c0_i32_0 = arith.constant 0 : i32
    %c0_i32_1 = arith.constant 0 : i32
    return %c0_i32, %c0_i32_0 : i32, i32
  }
  func.func @transform_4(%arg0: i32, %arg1: i32) -> (i32, i32) {
    %c0_i32 = arith.constant 0 : i32
    %c0_i32_0 = arith.constant 0 : i32
    %c0_i32_1 = arith.constant 0 : i32
    return %c0_i32, %c0_i32_0 : i32, i32
  }
  func.func @transform_5(%arg0: i32, %arg1: i32) -> (i32, i32) {
    %c0_i32 = arith.constant 0 : i32
    %c0_i32_0 = arith.constant 0 : i32
    %c0_i32_1 = arith.constant 0 : i32
    return %c0_i32, %c0_i32_0 : i32, i32
  }
  func.func @transform_6(%arg0: i32, %arg1: i32) -> (i32, i32) {
    %c0_i32 = arith.constant 0 : i32
    %c0_i32_0 = arith.constant 0 : i32
    return %arg0, %c0_i32 : i32, i32
  }
}

</mosaic_0001>

<bundles_post_ra>
// kernel: rnn_model_forward.1
= control target key start
LH: loop header
LB: loop body
LE: loop exit
PB: predicated region body
PF: predicated region fallthrough
CT: control target
= control target key end

     0   :  { %v1416_v0 = vmov 0.0   ;;  %vm1417_vm0 = vmmov 0   ;;  %vm45_vm1 = vcmask 130048   ;;  %s1944_s3 = inlined_call_operand.vmem [shape: f32[128,128], index: 3, kind: input, shape index: {}]   ;;  %s1945_s1 = inlined_call_operand.vmem [shape: f32[16,128], index: 1, kind: input, shape index: {}]   ;;  %s1946_s0 = inlined_call_operand.vmem [shape: f32[8,8,16], index: 0, kind: input, shape index: {}]   ;;  %s1947_s2 = inlined_call_operand.vmem [shape: f32[1,128], index: 2, kind: input, shape index: {}]   ;;  %s1948_s4 = inlined_call_operand.vmem [shape: f32[128,128], index: 4, kind: input, shape index: {}]   ;;  %s1949_s5 = inlined_call_operand.vmem [shape: f32[1,128], index: 5, kind: input, shape index: {}]   ;;  %s1950_s6 = inlined_call_operand.vmem [shape: f32[8,128], index: 6, kind: output, shape index: {}]  }
   0x1   :  { %1083 = vmatprep.subr.mxu1 %v1416_v0  ;;  %v1457_v1 = vld [vmem:[%s1944_s3 + $0x78] sm:$0xff]  ;;  %v1462_v2 = vld [vmem:[%s1944_s3 + $0x70] sm:$0xff]  ;;  %1115 = vmatprep.mubr.msk.f32.mxu1 %vm1417_vm0, %v1416_v0  ;;  %v1471_v3 = vld [vmem:[%s1944_s3 + $0x68] sm:$0xff] }
   0x2   :  { %1084 = vmatpush3.msra.mxu1 %v1457_v1  ;;  %v37_v4 = vld [vmem:[%s1945_s1 + $0x8] sm:$0xff]  ;;  %v1481_v5 = vld [vmem:[%s1944_s3 + $0x60] sm:$0xff]  ;;  %v1494_v8 = vld [vmem:[%s1944_s3 + $0x58] sm:$0xff] }
   0x3   :  { %1085 = vmatprep.subr.mxu1 %v1416_v0  ;;  %1067 = vmatprep.subr.mxu0 %v37_v4  ;;  %v36_v6 = vld [vmem:[%s1945_s1] sm:$0xff]  ;;  %v29_v9 = vld [vmem:[%s1946_s0 + $0x8] sm:$0xff]  ;;  %v1504_v10 = vld [vmem:[%s1944_s3 + $0x50] sm:$0xff] }
   0x4   :  { %1086 = vmatpush3.msra.mxu1 %v1462_v2  ;;  %1068 = vmatpush3.msra.mxu0 %v37_v4  ;;  %v28_v7 = vld [vmem:[%s1946_s0] sm:$0xff]  ;;  %v1513_v11 = vld [vmem:[%s1944_s3 + $0x48] sm:$0xff]  ;;  %v1531_v13 = vld [vmem:[%s1944_s3 + $0x38] sm:$0xff] }
   0x5   :  { %1087 = vmatprep.subr.mxu1 %v1416_v0  ;;  %1069 = vmatprep.subr.mxu0 %v36_v6  ;;  %v1522_v12 = vld [vmem:[%s1944_s3 + $0x40] sm:$0xff]  ;;  %v1540_v14 = vld [vmem:[%s1944_s3 + $0x30] sm:$0xff]  ;;  %v1549_v15 = vld [vmem:[%s1944_s3 + $0x28] sm:$0xff] }
   0x6   :  { %1088 = vmatpush3.msra.mxu1 %v1471_v3  ;;  %1070 = vmatpush3.msra.mxu0 %v36_v6  ;;  %v1558_v16 = vld [vmem:[%s1944_s3 + $0x20] sm:$0xff]  ;;  %v1567_v17 = vld [vmem:[%s1944_s3 + $0x18] sm:$0xff]  ;;  %v1576_v18 = vld [vmem:[%s1944_s3 + $0x10] sm:$0xff] }
   0x7   :  { %1089 = vmatprep.subr.mxu1 %v1416_v0  ;;  %1071 = vmatprep.mubr.msk.f32.mxu0 %vm45_vm1, %v28_v7  ;;  %v1585_v19 = vld [vmem:[%s1944_s3 + $0x8] sm:$0xff]  ;;  %v1594_v20 = vld [vmem:[%s1944_s3] sm:$0xff]  ;;  %v30_v21 = vld [vmem:[%s1946_s0 + $0x10] sm:$0xff] }
   0x8   :  { %1090 = vmatpush3.msra.mxu1 %v1481_v5  ;;  %1072 = vmatmul.mubr.msk.f32.vlgmr.msra.gmra.mxu0 %vm45_vm1, %v29_v9  ;;  %v31_v22 = vld [vmem:[%s1946_s0 + $0x18] sm:$0xff]  ;;  %v32_v23 = vld [vmem:[%s1946_s0 + $0x20] sm:$0xff]  ;;  %v33_v24 = vld [vmem:[%s1946_s0 + $0x28] sm:$0xff] }
   0x9   :  { %1091 = vmatprep.subr.mxu1 %v1416_v0  ;;  %1118 = vmatprep.subr.mxu0 %v1416_v0  ;;  %v34_v25 = vld [vmem:[%s1946_s0 + $0x30] sm:$0xff]  ;;  %v35_v26 = vld [vmem:[%s1946_s0 + $0x38] sm:$0xff]  ;;  %v1679_v28 = vld [vmem:[%s1947_s2] ss:$0 sm:$0xff] }
   0xa   :  { %1092 = vmatpush3.msra.mxu1 %v1494_v8  ;;  %1119 = vmatpush3.msra.mxu0 %v1457_v1  ;;  %v810_v4 = vld [vmem:[%s1948_s4 + $0x70] sm:$0xff]  ;;  %v808_v6 = vld [vmem:[%s1948_s4 + $0x60] sm:$0xff]  ;;  %v807_v7 = vld [vmem:[%s1948_s4 + $0x58] sm:$0xff] }
   0xb   :  { %1093 = vmatprep.subr.mxu1 %v1416_v0  ;;  %1120 = vmatprep.subr.mxu0 %v1416_v0  ;;  %v805_v9 = vld [vmem:[%s1948_s4 + $0x48] sm:$0xff] }
   0xc   :  { %1094 = vmatpush3.msra.mxu1 %v1504_v10  ;;  %1121 = vmatpush3.msra.mxu0 %v1462_v2 }
   0xd   :  { %1095 = vmatprep.subr.mxu1 %v1416_v0  ;;  %1122 = vmatprep.subr.mxu0 %v1416_v0 }
   0xe   :  { %1096 = vmatpush3.msra.mxu1 %v1513_v11  ;;  %1123 = vmatpush3.msra.mxu0 %v1471_v3 }
   0xf   :  { %1097 = vmatprep.subr.mxu1 %v1416_v0  ;;  %1124 = vmatprep.subr.mxu0 %v1416_v0 }
  0x10   :  { %1098 = vmatpush3.msra.mxu1 %v1522_v12  ;;  %1125 = vmatpush3.msra.mxu0 %v1481_v5 }
  0x11   :  { %1099 = vmatprep.subr.mxu1 %v1416_v0  ;;  %1126 = vmatprep.subr.mxu0 %v1416_v0 }
  0x12   :  { %1100 = vmatpush3.msra.mxu1 %v1531_v13  ;;  %1127 = vmatpush3.msra.mxu0 %v1494_v8 }
  0x13   :  { %1101 = vmatprep.subr.mxu1 %v1416_v0  ;;  %1128 = vmatprep.subr.mxu0 %v1416_v0 }
  0x14   :  { %1102 = vmatpush3.msra.mxu1 %v1540_v14  ;;  %1129 = vmatpush3.msra.mxu0 %v1504_v10 }
  0x15   :  { %1103 = vmatprep.subr.mxu1 %v1416_v0  ;;  %1130 = vmatprep.subr.mxu0 %v1416_v0 }
  0x16   :  { %1104 = vmatpush3.msra.mxu1 %v1549_v15  ;;  %1131 = vmatpush3.msra.mxu0 %v1513_v11 }
  0x17   :  { %1105 = vmatprep.subr.mxu1 %v1416_v0  ;;  %1132 = vmatprep.subr.mxu0 %v1416_v0 }
  0x18   :  { %1106 = vmatpush3.msra.mxu1 %v1558_v16  ;;  %1133 = vmatpush3.msra.mxu0 %v1522_v12 }
  0x19   :  { %1107 = vmatprep.subr.mxu1 %v1416_v0  ;;  %1134 = vmatprep.subr.mxu0 %v1416_v0 }
  0x1a   :  { %1108 = vmatpush3.msra.mxu1 %v1567_v17  ;;  %1135 = vmatpush3.msra.mxu0 %v1531_v13 }
  0x1b   :  { %1109 = vmatprep.subr.mxu1 %v1416_v0  ;;  %1136 = vmatprep.subr.mxu0 %v1416_v0 }
  0x1c   :  { %1110 = vmatpush3.msra.mxu1 %v1576_v18  ;;  %1137 = vmatpush3.msra.mxu0 %v1540_v14 }
  0x1d   :  { %1111 = vmatprep.subr.mxu1 %v1416_v0  ;;  %1138 = vmatprep.subr.mxu0 %v1416_v0 }
  0x1e   :  { %1112 = vmatpush3.msra.mxu1 %v1585_v19  ;;  %1139 = vmatpush3.msra.mxu0 %v1549_v15 }
  0x1f   :  { %1113 = vmatprep.subr.mxu1 %v1416_v0  ;;  %1140 = vmatprep.subr.mxu0 %v1416_v0 }
  0x20   :  { %1114 = vmatpush3.msra.mxu1 %v1594_v20  ;;  %1141 = vmatpush3.msra.mxu0 %v1558_v16 }
  0x21   :  { %1116 = vmatmul.mubr.f32.vlgmr.msra.gmra.mxu1 %v1416_v0  ;;  %1153 = vmatprep.subr.mxu1 %v1416_v0 }
  0x22   :  { %1142 = vmatprep.subr.mxu0 %v1416_v0  ;;  %1154 = vmatpush3.msra.mxu1 %v1457_v1 }
  0x23   :  { %1143 = vmatpush3.msra.mxu0 %v1567_v17  ;;  %1155 = vmatprep.subr.mxu1 %v1416_v0 }
  0x24   :  { %1144 = vmatprep.subr.mxu0 %v1416_v0  ;;  %1156 = vmatpush3.msra.mxu1 %v1462_v2 }
  0x25   :  { %1145 = vmatpush3.msra.mxu0 %v1576_v18  ;;  %1157 = vmatprep.subr.mxu1 %v1416_v0 }
  0x26   :  { %1146 = vmatprep.subr.mxu0 %v1416_v0  ;;  %1158 = vmatpush3.msra.mxu1 %v1471_v3 }
  0x27   :  { %1147 = vmatpush3.msra.mxu0 %v1585_v19  ;;  %1159 = vmatprep.subr.mxu1 %v1416_v0 }
  0x28   :  { %1148 = vmatprep.subr.mxu0 %v1416_v0  ;;  %1160 = vmatpush3.msra.mxu1 %v1481_v5 }
  0x29   :  { %1149 = vmatpush3.msra.mxu0 %v1594_v20  ;;  %1161 = vmatprep.subr.mxu1 %v1416_v0 }
  0x2a   :  { %1162 = vmatpush3.msra.mxu1 %v1494_v8  ;;  %1185 = vmatprep.mubr.msk.f32.mxu1 %vm1417_vm0, %v1416_v0 }
  0x2b   :  { %1163 = vmatprep.subr.mxu1 %v1416_v0  ;;  %1188 = vmatprep.subr.mxu0 %v1416_v0 }
  0x2c   :  { %1164 = vmatpush3.msra.mxu1 %v1504_v10  ;;  %1074 = vmatprep.mubr.msk.f32.mxu0 %vm45_vm1, %v30_v21  ;;  %v798_v21 = vld [vmem:[%s1948_s4 + $0x10] sm:$0xff] }
  0x2d   :  { %1165 = vmatprep.subr.mxu1 %v1416_v0  ;;  %1075 = vmatmul.mubr.msk.f32.gmra.mxu0 %vm45_vm1, %v31_v22  ;;  %v797_v22 = vld [vmem:[%s1948_s4 + $0x8] sm:$0xff] }
  0x2e   :  { %1166 = vmatpush3.msra.mxu1 %v1513_v11  ;;  %1077 = vmatprep.mubr.msk.f32.mxu0 %vm45_vm1, %v32_v23  ;;  %v796_v23 = vld [vmem:[%s1948_s4] sm:$0xff] }
  0x2f   :  { %1167 = vmatprep.subr.mxu1 %v1416_v0 }
  0x30   :  { %1168 = vmatpush3.msra.mxu1 %v1522_v12 }
  0x31   :  { %1169 = vmatprep.subr.mxu1 %v1416_v0  ;;  %1078 = vmatmul.mubr.msk.f32.gmra.mxu0 %vm45_vm1, %v33_v24 }
  0x32   :  { %1170 = vmatpush3.msra.mxu1 %v1531_v13  ;;  %1080 = vmatprep.mubr.msk.f32.mxu0 %vm45_vm1, %v34_v25 }
  0x33   :  { %1171 = vmatprep.subr.mxu1 %v1416_v0 }
  0x34   :  { %1172 = vmatpush3.msra.mxu1 %v1540_v14 }
  0x35   :  { %1173 = vmatprep.subr.mxu1 %v1416_v0  ;;  %1081 = vmatmul.mubr.msk.f32.gmra.mxu0 %vm45_vm1, %v35_v26 }
  0x36   :  { %1174 = vmatpush3.msra.mxu1 %v1549_v15  ;;  %1150 = vmatprep.mubr.msk.f32.mxu0 %vm1417_vm0, %v1416_v0 }
  0x37   :  { %1175 = vmatprep.subr.mxu1 %v1416_v0 }
  0x38   :  { %1176 = vmatpush3.msra.mxu1 %v1558_v16 }
  0x39   :  { %1177 = vmatprep.subr.mxu1 %v1416_v0 }
  0x3a   :  { %1178 = vmatpush3.msra.mxu1 %v1567_v17 }
  0x3b   :  { %1179 = vmatprep.subr.mxu1 %v1416_v0 }
  0x3c   :  { %1180 = vmatpush3.msra.mxu1 %v1576_v18 }
  0x3d   :  { %1181 = vmatprep.subr.mxu1 %v1416_v0 }
  0x3e   :  { %1182 = vmatpush3.msra.mxu1 %v1585_v19 }
  0x3f   :  { %1183 = vmatprep.subr.mxu1 %v1416_v0 }
  0x40   :  { %1184 = vmatpush3.msra.mxu1 %v1594_v20 }
  0x41   :  { %1223 = vmatprep.subr.mxu1 %v1416_v0 }
  0xc8   :  { %v1073_v27 = vpop.f32.mrf.mxu0 }
  0xc9   :  { %v142_v41 = vadd.f32 %v1073_v27, %v1679_v28 }
  0xca   :  { %v136_v29 = vpop.f32.mrf.mxu0 }
  0xcb   :  { %v137_v30 = vadd.f32 %v1679_v28, %v136_v29 }
  0xe1   :  { %v267_v31 = vpop.f32.mrf.mxu1 }
  0xe2   :  { %v271_v32 = vadd.f32 %v267_v31, %v137_v30  ;;  %v903_v30 = vld [vmem:[%s1949_s5] ss:$0 sm:$0xff] }
  0xe3   :  { %v1117_v33 = vpop.f32.mrf.mxu1 }
  0xe4   :  { %1400 = vtanh.f32 %v271_v32 }
  0xed   :  { %v1716_v35 = vpop.f32.mrf.mxu0 }
  0xee   :  { %v152_v51 = vadd.f32 %v1716_v35, %v1679_v28 }
  0xef   :  { %v146_v36 = vpop.f32.mrf.mxu0 }
  0xf0   :  { %v147_v46 = vadd.f32 %v1679_v28, %v146_v36 }
  0xf1   :  { %v1401_v34 = vpop.eup %1400  ;;  %v1718_v37 = vpop.f32.mrf.mxu0 }
  0xf2   :  { %1151 = vmatmul.mubr.f32.vlgmr.msra.gmra.mxu0 %v1401_v34  ;;  %v162_v61 = vadd.f32 %v1718_v37, %v1679_v28 }
  0xf3   :  { %1189 = vmatpush3.msra.mxu0 %v1457_v1  ;;  %1220 = vmatprep.mubr.msk.f32.mxu0 %vm1417_vm0, %v1416_v0  ;;  %v1720_v38 = vpop.f32.mrf.mxu0 }
  0xf4   :  { %1190 = vmatprep.subr.mxu0 %v1416_v0  ;;  %v157_v56 = vadd.f32 %v1679_v28, %v1720_v38 }
  0xf5   :  { %1191 = vmatpush3.msra.mxu0 %v1462_v2  ;;  %v1722_v39 = vpop.f32.mrf.mxu0 }
  0xf6   :  { %1192 = vmatprep.subr.mxu0 %v1416_v0  ;;  %v172_v24 = vadd.f32 %v1722_v39, %v1679_v28 }
  0xf7   :  { %1193 = vmatpush3.msra.mxu0 %v1471_v3  ;;  %v1724_v40 = vpop.f32.mrf.mxu0 }
  0xf8   :  { %1194 = vmatprep.subr.mxu0 %v1416_v0 }
  0xf9   :  { %1195 = vmatpush3.msra.mxu0 %v1481_v5 }
  0xfa   :  { %1196 = vmatprep.subr.mxu0 %v1416_v0 }
  0xfb   :  { %1197 = vmatpush3.msra.mxu0 %v1494_v8 }
  0xfc   :  { %1198 = vmatprep.subr.mxu0 %v1416_v0 }
  0xfd   :  { %1199 = vmatpush3.msra.mxu0 %v1504_v10 }
  0xfe   :  { %1200 = vmatprep.subr.mxu0 %v1416_v0 }
  0xff   :  { %1201 = vmatpush3.msra.mxu0 %v1513_v11 }
 0x100   :  { %1202 = vmatprep.subr.mxu0 %v1416_v0 }
 0x101   :  { %1203 = vmatpush3.msra.mxu0 %v1522_v12 }
 0x102   :  { %1204 = vmatprep.subr.mxu0 %v1416_v0 }
 0x103   :  { %1205 = vmatpush3.msra.mxu0 %v1531_v13 }
 0x104   :  { %1206 = vmatprep.subr.mxu0 %v1416_v0 }
 0x105   :  { %1207 = vmatpush3.msra.mxu0 %v1540_v14 }
 0x106   :  { %1208 = vmatprep.subr.mxu0 %v1416_v0 }
 0x107   :  { %1209 = vmatpush3.msra.mxu0 %v1549_v15 }
 0x108   :  { %1210 = vmatprep.subr.mxu0 %v1416_v0 }
 0x109   :  { %1211 = vmatpush3.msra.mxu0 %v1558_v16 }
 0x10a   :  { %1212 = vmatprep.subr.mxu0 %v1416_v0 }
 0x10b   :  { %1213 = vmatpush3.msra.mxu0 %v1567_v17 }
 0x10c   :  { %1214 = vmatprep.subr.mxu0 %v1416_v0 }
 0x10d   :  { %1215 = vmatpush3.msra.mxu0 %v1576_v18 }
 0x10e   :  { %1216 = vmatprep.subr.mxu0 %v1416_v0 }
 0x10f   :  { %1217 = vmatpush3.msra.mxu0 %v1585_v19 }
 0x110   :  { %1218 = vmatprep.subr.mxu0 %v1416_v0 }
 0x111   :  { %1219 = vmatpush3.msra.mxu0 %v1594_v20 }
 0x112   :  { %1258 = vmatprep.subr.mxu0 %v1416_v0 }
 0x1b2   :  { %v341_v42 = vpop.f32.mrf.mxu0 }
 0x1b3   :  { %v345_v43 = vadd.f32 %v341_v42, %v142_v41 }
 0x1b4   :  { %v1152_v44 = vpop.f32.mrf.mxu0 }
 0x1b5   :  { %1402 = vtanh.f32 %v345_v43 }
 0x1c2   :  { %v1403_v45 = vpop.eup %1402 }
 0x1c3   :  { %1186 = vmatmul.mubr.f32.vlgmr.msra.gmra.mxu1 %v1403_v45 }
 0x1c4   :  { %1224 = vmatpush3.msra.mxu1 %v1457_v1  ;;  %1255 = vmatprep.mubr.msk.f32.mxu1 %vm1417_vm0, %v1416_v0 }
 0x1c5   :  { %1225 = vmatprep.subr.mxu1 %v1416_v0 }
 0x1c6   :  { %1226 = vmatpush3.msra.mxu1 %v1462_v2 }
 0x1c7   :  { %1227 = vmatprep.subr.mxu1 %v1416_v0 }
 0x1c8   :  { %1228 = vmatpush3.msra.mxu1 %v1471_v3 }
 0x1c9   :  { %1229 = vmatprep.subr.mxu1 %v1416_v0 }
 0x1ca   :  { %1230 = vmatpush3.msra.mxu1 %v1481_v5 }
 0x1cb   :  { %1231 = vmatprep.subr.mxu1 %v1416_v0 }
 0x1cc   :  { %1232 = vmatpush3.msra.mxu1 %v1494_v8 }
 0x1cd   :  { %1233 = vmatprep.subr.mxu1 %v1416_v0 }
 0x1ce   :  { %1234 = vmatpush3.msra.mxu1 %v1504_v10 }
 0x1cf   :  { %1235 = vmatprep.subr.mxu1 %v1416_v0 }
 0x1d0   :  { %1236 = vmatpush3.msra.mxu1 %v1513_v11 }
 0x1d1   :  { %1237 = vmatprep.subr.mxu1 %v1416_v0 }
 0x1d2   :  { %1238 = vmatpush3.msra.mxu1 %v1522_v12 }
 0x1d3   :  { %1239 = vmatprep.subr.mxu1 %v1416_v0 }
 0x1d4   :  { %1240 = vmatpush3.msra.mxu1 %v1531_v13 }
 0x1d5   :  { %1241 = vmatprep.subr.mxu1 %v1416_v0 }
 0x1d6   :  { %1242 = vmatpush3.msra.mxu1 %v1540_v14 }
 0x1d7   :  { %1243 = vmatprep.subr.mxu1 %v1416_v0 }
 0x1d8   :  { %1244 = vmatpush3.msra.mxu1 %v1549_v15 }
 0x1d9   :  { %1245 = vmatprep.subr.mxu1 %v1416_v0 }
 0x1da   :  { %1246 = vmatpush3.msra.mxu1 %v1558_v16 }
 0x1db   :  { %1247 = vmatprep.subr.mxu1 %v1416_v0 }
 0x1dc   :  { %1248 = vmatpush3.msra.mxu1 %v1567_v17 }
 0x1dd   :  { %1249 = vmatprep.subr.mxu1 %v1416_v0 }
 0x1de   :  { %1250 = vmatpush3.msra.mxu1 %v1576_v18 }
 0x1df   :  { %1251 = vmatprep.subr.mxu1 %v1416_v0 }
 0x1e0   :  { %1252 = vmatpush3.msra.mxu1 %v1585_v19 }
 0x1e1   :  { %1253 = vmatprep.subr.mxu1 %v1416_v0 }
 0x1e2   :  { %1254 = vmatpush3.msra.mxu1 %v1594_v20 }
 0x1e3   :  { %1293 = vmatprep.subr.mxu1 %v1416_v0 }
 0x283   :  { %v415_v47 = vpop.f32.mrf.mxu1 }
 0x284   :  { %v419_v48 = vadd.f32 %v415_v47, %v147_v46 }
 0x285   :  { %v1187_v49 = vpop.f32.mrf.mxu1 }
 0x286   :  { %1404 = vtanh.f32 %v419_v48 }
 0x293   :  { %v1405_v50 = vpop.eup %1404 }
 0x294   :  { %1221 = vmatmul.mubr.f32.vlgmr.msra.gmra.mxu0 %v1405_v50 }
 0x295   :  { %1259 = vmatpush3.msra.mxu0 %v1457_v1  ;;  %1290 = vmatprep.mubr.msk.f32.mxu0 %vm1417_vm0, %v1416_v0 }
 0x296   :  { %1260 = vmatprep.subr.mxu0 %v1416_v0 }
 0x297   :  { %1261 = vmatpush3.msra.mxu0 %v1462_v2 }
 0x298   :  { %1262 = vmatprep.subr.mxu0 %v1416_v0 }
 0x299   :  { %1263 = vmatpush3.msra.mxu0 %v1471_v3 }
 0x29a   :  { %1264 = vmatprep.subr.mxu0 %v1416_v0 }
 0x29b   :  { %1265 = vmatpush3.msra.mxu0 %v1481_v5 }
 0x29c   :  { %1266 = vmatprep.subr.mxu0 %v1416_v0 }
 0x29d   :  { %1267 = vmatpush3.msra.mxu0 %v1494_v8 }
 0x29e   :  { %1268 = vmatprep.subr.mxu0 %v1416_v0 }
 0x29f   :  { %1269 = vmatpush3.msra.mxu0 %v1504_v10 }
 0x2a0   :  { %1270 = vmatprep.subr.mxu0 %v1416_v0 }
 0x2a1   :  { %1271 = vmatpush3.msra.mxu0 %v1513_v11 }
 0x2a2   :  { %1272 = vmatprep.subr.mxu0 %v1416_v0 }
 0x2a3   :  { %1273 = vmatpush3.msra.mxu0 %v1522_v12 }
 0x2a4   :  { %1274 = vmatprep.subr.mxu0 %v1416_v0 }
 0x2a5   :  { %1275 = vmatpush3.msra.mxu0 %v1531_v13 }
 0x2a6   :  { %1276 = vmatprep.subr.mxu0 %v1416_v0 }
 0x2a7   :  { %1277 = vmatpush3.msra.mxu0 %v1540_v14 }
 0x2a8   :  { %1278 = vmatprep.subr.mxu0 %v1416_v0 }
 0x2a9   :  { %1279 = vmatpush3.msra.mxu0 %v1549_v15 }
 0x2aa   :  { %1280 = vmatprep.subr.mxu0 %v1416_v0 }
 0x2ab   :  { %1281 = vmatpush3.msra.mxu0 %v1558_v16 }
 0x2ac   :  { %1282 = vmatprep.subr.mxu0 %v1416_v0 }
 0x2ad   :  { %1283 = vmatpush3.msra.mxu0 %v1567_v17 }
 0x2ae   :  { %1284 = vmatprep.subr.mxu0 %v1416_v0 }
 0x2af   :  { %1285 = vmatpush3.msra.mxu0 %v1576_v18 }
 0x2b0   :  { %1286 = vmatprep.subr.mxu0 %v1416_v0 }
 0x2b1   :  { %1287 = vmatpush3.msra.mxu0 %v1585_v19 }
 0x2b2   :  { %1288 = vmatprep.subr.mxu0 %v1416_v0 }
 0x2b3   :  { %1289 = vmatpush3.msra.mxu0 %v1594_v20 }
 0x2b4   :  { %1328 = vmatprep.subr.mxu0 %v1416_v0 }
 0x354   :  { %v489_v52 = vpop.f32.mrf.mxu0 }
 0x355   :  { %v493_v53 = vadd.f32 %v489_v52, %v152_v51 }
 0x356   :  { %v1222_v54 = vpop.f32.mrf.mxu0 }
 0x357   :  { %1406 = vtanh.f32 %v493_v53 }
 0x364   :  { %v1407_v55 = vpop.eup %1406 }
 0x365   :  { %1256 = vmatmul.mubr.f32.vlgmr.msra.gmra.mxu1 %v1407_v55 }
 0x366   :  { %1294 = vmatpush3.msra.mxu1 %v1457_v1  ;;  %1325 = vmatprep.mubr.msk.f32.mxu1 %vm1417_vm0, %v1416_v0 }
 0x367   :  { %1295 = vmatprep.subr.mxu1 %v1416_v0 }
 0x368   :  { %1296 = vmatpush3.msra.mxu1 %v1462_v2 }
 0x369   :  { %1297 = vmatprep.subr.mxu1 %v1416_v0 }
 0x36a   :  { %1298 = vmatpush3.msra.mxu1 %v1471_v3 }
 0x36b   :  { %1299 = vmatprep.subr.mxu1 %v1416_v0 }
 0x36c   :  { %1300 = vmatpush3.msra.mxu1 %v1481_v5 }
 0x36d   :  { %1301 = vmatprep.subr.mxu1 %v1416_v0 }
 0x36e   :  { %1302 = vmatpush3.msra.mxu1 %v1494_v8 }
 0x36f   :  { %1303 = vmatprep.subr.mxu1 %v1416_v0 }
 0x370   :  { %1304 = vmatpush3.msra.mxu1 %v1504_v10 }
 0x371   :  { %1305 = vmatprep.subr.mxu1 %v1416_v0 }
 0x372   :  { %1306 = vmatpush3.msra.mxu1 %v1513_v11 }
 0x373   :  { %1307 = vmatprep.subr.mxu1 %v1416_v0 }
 0x374   :  { %1308 = vmatpush3.msra.mxu1 %v1522_v12 }
 0x375   :  { %1309 = vmatprep.subr.mxu1 %v1416_v0 }
 0x376   :  { %1310 = vmatpush3.msra.mxu1 %v1531_v13 }
 0x377   :  { %1311 = vmatprep.subr.mxu1 %v1416_v0 }
 0x378   :  { %1312 = vmatpush3.msra.mxu1 %v1540_v14 }
 0x379   :  { %1313 = vmatprep.subr.mxu1 %v1416_v0 }
 0x37a   :  { %1314 = vmatpush3.msra.mxu1 %v1549_v15 }
 0x37b   :  { %1315 = vmatprep.subr.mxu1 %v1416_v0 }
 0x37c   :  { %1316 = vmatpush3.msra.mxu1 %v1558_v16 }
 0x37d   :  { %1317 = vmatprep.subr.mxu1 %v1416_v0 }
 0x37e   :  { %1318 = vmatpush3.msra.mxu1 %v1567_v17 }
 0x37f   :  { %1319 = vmatprep.subr.mxu1 %v1416_v0 }
 0x380   :  { %1320 = vmatpush3.msra.mxu1 %v1576_v18 }
 0x381   :  { %1321 = vmatprep.subr.mxu1 %v1416_v0 }
 0x382   :  { %1322 = vmatpush3.msra.mxu1 %v1585_v19 }
 0x383   :  { %1323 = vmatprep.subr.mxu1 %v1416_v0 }
 0x384   :  { %1324 = vmatpush3.msra.mxu1 %v1594_v20 }
 0x385   :  { %1363 = vmatprep.subr.mxu1 %v1416_v0 }
 0x425   :  { %v563_v57 = vpop.f32.mrf.mxu1 }
 0x426   :  { %v567_v58 = vadd.f32 %v563_v57, %v157_v56 }
 0x427   :  { %v1257_v59 = vpop.f32.mrf.mxu1 }
 0x428   :  { %1408 = vtanh.f32 %v567_v58 }
 0x435   :  { %v1409_v60 = vpop.eup %1408 }
 0x436   :  { %1291 = vmatmul.mubr.f32.vlgmr.msra.gmra.mxu0 %v1409_v60 }
 0x437   :  { %1329 = vmatpush3.msra.mxu0 %v1457_v1  ;;  %1360 = vmatprep.mubr.msk.f32.mxu0 %vm1417_vm0, %v1416_v0 }
 0x438   :  { %1330 = vmatprep.subr.mxu0 %v1416_v0 }
 0x439   :  { %1331 = vmatpush3.msra.mxu0 %v1462_v2 }
 0x43a   :  { %1332 = vmatprep.subr.mxu0 %v1416_v0 }
 0x43b   :  { %1333 = vmatpush3.msra.mxu0 %v1471_v3  ;;  %v811_v3 = vld [vmem:[%s1948_s4 + $0x78] sm:$0xff] }
 0x43c   :  { %1334 = vmatprep.subr.mxu0 %v1416_v0 }
 0x43d   :  { %1335 = vmatpush3.msra.mxu0 %v1481_v5  ;;  %v809_v5 = vld [vmem:[%s1948_s4 + $0x68] sm:$0xff] }
 0x43e   :  { %1336 = vmatprep.subr.mxu0 %v1416_v0 }
 0x43f   :  { %1337 = vmatpush3.msra.mxu0 %v1494_v8  ;;  %v806_v8 = vld [vmem:[%s1948_s4 + $0x50] sm:$0xff] }
 0x440   :  { %1338 = vmatprep.subr.mxu0 %v1416_v0 }
 0x441   :  { %1339 = vmatpush3.msra.mxu0 %v1504_v10  ;;  %v167_v10 = vadd.f32 %v1679_v28, %v1724_v40 }
 0x442   :  { %1340 = vmatprep.subr.mxu0 %v1416_v0 }
 0x443   :  { %1341 = vmatpush3.msra.mxu0 %v1513_v11 }
 0x444   :  { %1342 = vmatprep.subr.mxu0 %v1416_v0 }
 0x445   :  { %1343 = vmatpush3.msra.mxu0 %v1522_v12 }
 0x446   :  { %1344 = vmatprep.subr.mxu0 %v1416_v0 }
 0x447   :  { %1345 = vmatpush3.msra.mxu0 %v1531_v13 }
 0x448   :  { %1346 = vmatprep.subr.mxu0 %v1416_v0 }
 0x449   :  { %1347 = vmatpush3.msra.mxu0 %v1540_v14 }
 0x44a   :  { %1348 = vmatprep.subr.mxu0 %v1416_v0 }
 0x44b   :  { %1349 = vmatpush3.msra.mxu0 %v1549_v15  ;;  %v804_v15 = vld [vmem:[%s1948_s4 + $0x40] sm:$0xff] }
 0x44c   :  { %1350 = vmatprep.subr.mxu0 %v1416_v0 }
 0x44d   :  { %1351 = vmatpush3.msra.mxu0 %v1558_v16  ;;  %v803_v16 = vld [vmem:[%s1948_s4 + $0x38] sm:$0xff] }
 0x44e   :  { %1352 = vmatprep.subr.mxu0 %v1416_v0 }
 0x44f   :  { %1353 = vmatpush3.msra.mxu0 %v1567_v17  ;;  %v802_v17 = vld [vmem:[%s1948_s4 + $0x30] sm:$0xff] }
 0x450   :  { %1354 = vmatprep.subr.mxu0 %v1416_v0 }
 0x451   :  { %1355 = vmatpush3.msra.mxu0 %v1576_v18  ;;  %v801_v18 = vld [vmem:[%s1948_s4 + $0x28] sm:$0xff] }
 0x452   :  { %1356 = vmatprep.subr.mxu0 %v1416_v0 }
 0x453   :  { %1357 = vmatpush3.msra.mxu0 %v1585_v19  ;;  %v800_v19 = vld [vmem:[%s1948_s4 + $0x20] sm:$0xff] }
 0x454   :  { %1358 = vmatprep.subr.mxu0 %v1416_v0 }
 0x455   :  { %1359 = vmatpush3.msra.mxu0 %v1594_v20  ;;  %v799_v20 = vld [vmem:[%s1948_s4 + $0x18] sm:$0xff] }
 0x4f6   :  { %v637_v62 = vpop.f32.mrf.mxu0 }
 0x4f7   :  { %v641_v63 = vadd.f32 %v637_v62, %v162_v61 }
 0x4f8   :  { %v1292_v1 = vpop.f32.mrf.mxu0 }
 0x4f9   :  { %1410 = vtanh.f32 %v641_v63 }
 0x506   :  { %v1411_v2 = vpop.eup %1410 }
 0x507   :  { %1326 = vmatmul.mubr.f32.vlgmr.msra.gmra.mxu1 %v1411_v2 }
 0x508   :  { %1395 = vmatprep.mubr.msk.f32.mxu1 %vm1417_vm0, %v1416_v0  ;;  %1364 = vmatpush3.msra.mxu1 %v811_v3 }
 0x509   :  { %1365 = vmatprep.subr.mxu1 %v1416_v0 }
 0x50a   :  { %1366 = vmatpush3.msra.mxu1 %v810_v4 }
 0x50b   :  { %1367 = vmatprep.subr.mxu1 %v1416_v0 }
 0x50c   :  { %1368 = vmatpush3.msra.mxu1 %v809_v5 }
 0x50d   :  { %1369 = vmatprep.subr.mxu1 %v1416_v0 }
 0x50e   :  { %1370 = vmatpush3.msra.mxu1 %v808_v6 }
 0x50f   :  { %1371 = vmatprep.subr.mxu1 %v1416_v0 }
 0x510   :  { %1372 = vmatpush3.msra.mxu1 %v807_v7 }
 0x511   :  { %1373 = vmatprep.subr.mxu1 %v1416_v0 }
 0x512   :  { %1374 = vmatpush3.msra.mxu1 %v806_v8 }
 0x513   :  { %1375 = vmatprep.subr.mxu1 %v1416_v0 }
 0x514   :  { %1376 = vmatpush3.msra.mxu1 %v805_v9 }
 0x515   :  { %1377 = vmatprep.subr.mxu1 %v1416_v0 }
 0x516   :  { %1378 = vmatpush3.msra.mxu1 %v804_v15 }
 0x517   :  { %1379 = vmatprep.subr.mxu1 %v1416_v0 }
 0x518   :  { %1380 = vmatpush3.msra.mxu1 %v803_v16 }
 0x519   :  { %1381 = vmatprep.subr.mxu1 %v1416_v0 }
 0x51a   :  { %1382 = vmatpush3.msra.mxu1 %v802_v17 }
 0x51b   :  { %1383 = vmatprep.subr.mxu1 %v1416_v0 }
 0x51c   :  { %1384 = vmatpush3.msra.mxu1 %v801_v18 }
 0x51d   :  { %1385 = vmatprep.subr.mxu1 %v1416_v0 }
 0x51e   :  { %1386 = vmatpush3.msra.mxu1 %v800_v19 }
 0x51f   :  { %1387 = vmatprep.subr.mxu1 %v1416_v0 }
 0x520   :  { %1388 = vmatpush3.msra.mxu1 %v799_v20 }
 0x521   :  { %1389 = vmatprep.subr.mxu1 %v1416_v0 }
 0x522   :  { %1390 = vmatpush3.msra.mxu1 %v798_v21 }
 0x523   :  { %1391 = vmatprep.subr.mxu1 %v1416_v0 }
 0x524   :  { %1392 = vmatpush3.msra.mxu1 %v797_v22 }
 0x525   :  { %1393 = vmatprep.subr.mxu1 %v1416_v0 }
 0x526   :  { %1394 = vmatpush3.msra.mxu1 %v796_v23 }
 0x5c7   :  { %v711_v11 = vpop.f32.mrf.mxu1 }
 0x5c8   :  { %v715_v12 = vadd.f32 %v711_v11, %v167_v10 }
 0x5c9   :  { %v1327_v13 = vpop.f32.mrf.mxu1 }
 0x5ca   :  { %1412 = vtanh.f32 %v715_v12 }
 0x5d7   :  { %v1413_v14 = vpop.eup %1412 }
 0x5d8   :  { %1361 = vmatmul.mubr.f32.vlgmr.msra.gmra.mxu0 %v1413_v14 }
 0x698   :  { %v785_v25 = vpop.f32.mrf.mxu0 }
 0x699   :  { %v789_v26 = vadd.f32 %v785_v25, %v172_v24 }
 0x69a   :  { %v1362_v27 = vpop.f32.mrf.mxu0 }
 0x69b   :  { %1414 = vtanh.f32 %v789_v26 }
 0x6a8   :  { %v1415_v29 = vpop.eup %1414 }
 0x6a9   :  { %1396 = vmatmul.mubr.f32.vlgmr.msra.gmra.mxu1 %v1415_v29 }
 0x769   :  { %v885_v31 = vpop.f32.mrf.mxu1 }
 0x76a   :  { %v886_v32 = vadd.f32 %v903_v30, %v885_v31 }
 0x76b   :  { %v1397_v33 = vpop.f32.mrf.mxu1 }
 0x76c   :  { %889 = vst [vmem:[%s1950_s6] sm:$0xff] %v886_v32 }

</bundles_post_ra>
